<compile_context>
chip_gen: v7x
topology: tpu7x:2x2x1
jax: 0.10.0
libtpu: 0.0.40
codegen_flags: <defaults>
</compile_context>

<pallas_src>
import jax
import jax.numpy as jnp
from jax.experimental import pallas as pl
from jax.experimental.pallas import tpu as pltpu


_LANE = 128          # last-dim tiles must be multiples of 128 lanes
_SUBLANE = 8         # f32 sublane count
_TN_TARGET = 8192    # layer-3 tile width: 512x8192 bf16 = 8 MiB (x2 buffers)
_H1, _H2 = 256, 512  # hidden widths of the hypernetwork trunk


def _round_up(x, m):
    return ((x + m - 1) // m) * m


def _tile_config(out_dim):
    """(TN, N_pad): lane-dense layer-3 tile width and padded output width.

    If the padded width fits in <= 2 target tiles, split it into exactly 2
    lane-dense tiles (when >= 256 lanes) so both v7x TensorCores get work;
    otherwise stream _TN_TARGET-wide tiles.
    """
    n_lane = _round_up(out_dim, _LANE)
    n_blocks = n_lane // _LANE
    if n_lane <= 2 * _TN_TARGET:
        if n_blocks < 2:
            return n_lane, n_lane           # single 128-lane tile, cannot split
        tn = ((n_blocks + 1) // 2) * _LANE  # exactly 2 tiles
        return tn, 2 * tn
    return _TN_TARGET, _round_up(n_lane, _TN_TARGET)


def _vmem_limit_bytes(B_pad, zdim, TN):
    """Explicit VMEM budget: streamed double buffers + resident trunk blocks."""
    streamed = 2 * (_H2 * TN * 2      # w3 tile (bf16), double-buffered
                    + TN * 4          # b3 tile (f32)
                    + B_pad * TN * 4)  # output tile (f32)
    resident = (B_pad * zdim * 4 + zdim * _H1 * 2 + _H1 * 4
                + _H1 * _H2 * 2 + _H2 * 4)
    need = streamed + resident + (4 << 20)          # slack for compiler scratch
    return int(min(max(need, 32 << 20), 48 << 20))  # v7x physical VMEM = 64 MiB/TC


# --------------------------------------------------------------------------
# Kernel
# --------------------------------------------------------------------------
def _hypernet_kernel(z_ref, w1_ref, b1_ref, w2_ref, b2_ref,
                     w3_ref, b3_ref, out_ref):
    # --- trunk MLP (tiny, recomputed per tile; hidden under the w3 DMA) ---
    h1 = jnp.dot(z_ref[...].astype(jnp.bfloat16), w1_ref[...],
                 preferred_element_type=jnp.float32)
    h1 = jnp.maximum(h1 + b1_ref[...], 0.0)
    h2 = jnp.dot(h1.astype(jnp.bfloat16), w2_ref[...],
                 preferred_element_type=jnp.float32)
    h2 = jnp.maximum(h2 + b2_ref[...], 0.0).astype(jnp.bfloat16)
    # --- layer-3 tile: (B,512) @ (512,TN) + b3, lane-dense f32 store ------
    acc = jnp.dot(h2, w3_ref[...], preferred_element_type=jnp.float32)
    out_ref[...] = (acc + b3_ref[...]).astype(out_ref.dtype)


# --------------------------------------------------------------------------
# Wrapper
# --------------------------------------------------------------------------
def hypernetwork_forward(z, prepared, *, wdim, num_layers):
    """z: (B, zdim) f32  ->  (num_layers, B, wdim) f32."""
    w1, b1, w2, b2, w3p, b3p = prepared
    B, zdim = z.shape
    out_dim = wdim * num_layers
    TN, N_pad = _tile_config(out_dim)
    assert w3p.shape == (_H2, N_pad) and b3p.shape == (1, N_pad)

    # Pad batch to the f32 sublane count so activation tiles are aligned.
    B_pad = _round_up(max(B, _SUBLANE), _SUBLANE)
    if B_pad != B:
        z = jnp.pad(z, ((0, B_pad - B), (0, 0)))

    num_tiles = N_pad // TN

    def full(a):  # whole-array resident block, constant index_map (fetched once)
        return pl.BlockSpec(a.shape, lambda j: (0,) * a.ndim)

    cost = pl.CostEstimate(
        flops=int(2 * B_pad * (zdim * _H1 + _H1 * _H2) * num_tiles
                  + 2 * B_pad * _H2 * N_pad),
        transcendentals=0,
        bytes_accessed=int(z.size * 4 + w1.size * 2 + b1.size * 4
                           + w2.size * 2 + b2.size * 4
                           + w3p.size * 2 + b3p.size * 4
                           + B_pad * N_pad * 4),
    )

    flat = pl.pallas_call(
        _hypernet_kernel,
        out_shape=jax.ShapeDtypeStruct((B_pad, N_pad), jnp.float32),
        grid_spec=pltpu.PrefetchScalarGridSpec(
            num_scalar_prefetch=0,
            grid=(num_tiles,),
            in_specs=[
                full(z),                                     # resident
                full(w1), full(b1), full(w2), full(b2),      # resident trunk
                pl.BlockSpec((_H2, TN), lambda j: (0, j)),   # streamed w3
                pl.BlockSpec((1, TN), lambda j: (0, j)),     # streamed b3
            ],
            out_specs=pl.BlockSpec((B_pad, TN), lambda j: (0, j)),
        ),
        compiler_params=pltpu.CompilerParams(
            dimension_semantics=("parallel",),               # 2nd TC on v7x
            vmem_limit_bytes=_vmem_limit_bytes(B_pad, zdim, TN),
        ),
        cost_estimate=cost,
    )(z, w1, b1, w2, b2, w3p, b3p)

    # torch's layers(z).reshape(num_layers, B, wdim) is a raw row-major
    # reinterpretation of the (B, num_layers*wdim) matrix; jnp matches it
    # exactly.  The slice only copies when padding exists.
    # TODO(synk): for very large B pick a lane-aligned wdim*num_layers (or
    # de-pad inside the last tile) so the slice stays a free bitcast.
    return flat[:B, :out_dim].reshape(num_layers, B, wdim)


# --------------------------------------------------------------------------
# Params
# --------------------------------------------------------------------------
def init_params(key, zdim, wdim, num_layers):
    """f32 params mimicking torch.nn.Linear default init (uniform +-1/sqrt(fan_in)).

    Weights are stored as (in_features, out_features) so the kernel computes
    x @ W + b (== PyTorch's x @ W.T + b with W of shape (out, in))."""
    dims = [(zdim, _H1), (_H1, _H2), (_H2, wdim * num_layers)]
    params = []
    for fan_in, fan_out in dims:
        kw, kb, key = jax.random.split(key, 3)
        bound = 1.0 / jnp.sqrt(float(fan_in))
        w = jax.random.uniform(kw, (fan_in, fan_out), jnp.float32, -bound, bound)
        b = jax.random.uniform(kb, (1, fan_out), jnp.float32, -bound, bound)
        params += [w, b]
    return tuple(params)


def prepare_params(params, *, wdim, num_layers):
    """One-time packing: bf16 weights, layer-3 padded to a lane-dense width."""
    w1, b1, w2, b2, w3, b3 = params
    out_dim = wdim * num_layers
    _, N_pad = _tile_config(out_dim)
    pad = N_pad - out_dim
    w3p = jnp.pad(w3, ((0, 0), (0, pad)))
    b3p = jnp.pad(b3, ((0, 0), (0, pad)))
    return (w1.astype(jnp.bfloat16), b1,
            w2.astype(jnp.bfloat16), b2,
            w3p.astype(jnp.bfloat16), b3p)


# --------------------------------------------------------------------------
# References
# --------------------------------------------------------------------------
def reference_forward_f32(z, params, *, wdim, num_layers):
    """Exact f32 semantics of the PyTorch module."""
    w1, b1, w2, b2, w3, b3 = params
    h = jnp.maximum(z @ w1 + b1, 0.0)
    h = jnp.maximum(h @ w2 + b2, 0.0)
    h = h @ w3 + b3
    return h.reshape(num_layers, z.shape[0], wdim)


def reference_forward_bf16(z, params, *, wdim, num_layers):
    """Plain-JAX reference with the kernel's bf16-weight / f32-accumulate numerics."""
    w1, b1, w2, b2, w3, b3 = params

    def lin(x, w, b):
        return jnp.dot(x.astype(jnp.bfloat16), w.astype(jnp.bfloat16),
                       preferred_element_type=jnp.float32) + b

    h = jnp.maximum(lin(z, w1, b1), 0.0)
    h = jnp.maximum(lin(h, w2, b2), 0.0)
    h = lin(h, w3, b3)
    return h.reshape(num_layers, z.shape[0], wdim)


if __name__ == "__main__":
    zdim, wdim, num_layers = 32, 16, 3
    B = 2

    key = jax.random.PRNGKey(0)
    kz, kp = jax.random.split(key)
    z = jax.random.normal(kz, (B, zdim), jnp.float32)
    params = init_params(kp, zdim, wdim, num_layers)
    prepared = prepare_params(params, wdim=wdim, num_layers=num_layers)

    out = hypernetwork_forward(z, prepared, wdim=wdim, num_layers=num_layers)
    out = jax.block_until_ready(out)
    assert out.shape == (num_layers, B, wdim), out.shape

    # Tight check against a reference with identical bf16 numerics (kernel
    # structure correctness), plus a sanity check against the true f32 module.
    ref_bf16 = reference_forward_bf16(z, params, wdim=wdim, num_layers=num_layers)
    assert jnp.allclose(out, ref_bf16, atol=1e-3, rtol=1e-3), \
        float(jnp.max(jnp.abs(out - ref_bf16)))
    ref_f32 = reference_forward_f32(z, params, wdim=wdim, num_layers=num_layers)
    assert jnp.allclose(out, ref_f32, atol=2e-2, rtol=2e-2), \
        float(jnp.max(jnp.abs(out - ref_f32)))

    print("KERNEL_OK")
</pallas_src>

<mosaic_0001>
module attributes {stable_mosaic.version = 11 : i64} {
  func.func @_hypernet_kernel(%arg0: i32, %arg1: memref<8x32xf32, #tpu.memory_space<vmem>>, %arg2: memref<32x256xbf16, #tpu.memory_space<vmem>>, %arg3: memref<1x256xf32, #tpu.memory_space<vmem>>, %arg4: memref<256x512xbf16, #tpu.memory_space<vmem>>, %arg5: memref<1x512xf32, #tpu.memory_space<vmem>>, %arg6: memref<512x128xbf16, #tpu.memory_space<vmem>>, %arg7: memref<1x128xf32, #tpu.memory_space<vmem>>, %arg8: memref<8x128xf32, #tpu.memory_space<vmem>>) attributes {dimension_semantics = [#tpu.dimension_semantics<parallel>], iteration_bounds = array<i64: 1>, scalar_prefetch = 0 : i64, scratch_operands = 0 : i64, tpu.core_type = #tpu.core_type<tc>, window_params = [{pipeline_mode = #tpu.pipeline_mode<synchronous>, transform_indices = @transform_0, window_bounds = array<i64: 8, 32>}, {pipeline_mode = #tpu.pipeline_mode<synchronous>, transform_indices = @transform_1, window_bounds = array<i64: 32, 256>}, {pipeline_mode = #tpu.pipeline_mode<synchronous>, transform_indices = @transform_2, window_bounds = array<i64: 1, 256>}, {pipeline_mode = #tpu.pipeline_mode<synchronous>, transform_indices = @transform_3, window_bounds = array<i64: 256, 512>}, {pipeline_mode = #tpu.pipeline_mode<synchronous>, transform_indices = @transform_4, window_bounds = array<i64: 1, 512>}, {transform_indices = @transform_5, window_bounds = array<i64: 512, 128>}, {transform_indices = @transform_6, window_bounds = array<i64: 1, 128>}, {transform_indices = @transform_7, window_bounds = array<i64: 8, 128>}]} {
    %c0 = arith.constant 0 : index
    %c0_0 = arith.constant 0 : index
    %0 = vector.load %arg1[%c0, %c0_0] : memref<8x32xf32, #tpu.memory_space<vmem>>, vector<8x32xf32>
    %1 = arith.truncf %0 : vector<8x32xf32> to vector<8x32xbf16>
    %c0_1 = arith.constant 0 : index
    %c0_2 = arith.constant 0 : index
    %2 = vector.load %arg2[%c0_1, %c0_2] : memref<32x256xbf16, #tpu.memory_space<vmem>>, vector<32x256xbf16>
    %cst = arith.constant dense<0.000000e+00> : vector<8x256xf32>
    %3 = tpu.matmul %1, %2, %cst {dimension_numbers = #tpu.dot_dimension_numbers<[1], [0], [0], [1], [0, 0, 1, 1], [], []>} : vector<8x32xbf16>, vector<32x256xbf16>, vector<8x256xf32> -> vector<8x256xf32>
    %c0_3 = arith.constant 0 : index
    %c0_4 = arith.constant 0 : index
    %4 = vector.load %arg3[%c0_3, %c0_4] : memref<1x256xf32, #tpu.memory_space<vmem>>, vector<1x256xf32>
    %5 = vector.broadcast %4 : vector<1x256xf32> to vector<8x256xf32>
    %6 = arith.addf %3, %5 : vector<8x256xf32>
    %cst_5 = arith.constant 0.000000e+00 : f32
    %7 = vector.broadcast %cst_5 : f32 to vector<8x256xf32>
    %8 = arith.maximumf %6, %7 : vector<8x256xf32>
    %9 = arith.truncf %8 : vector<8x256xf32> to vector<8x256xbf16>
    %c0_6 = arith.constant 0 : index
    %c0_7 = arith.constant 0 : index
    %10 = vector.load %arg4[%c0_6, %c0_7] : memref<256x512xbf16, #tpu.memory_space<vmem>>, vector<256x512xbf16>
    %cst_8 = arith.constant dense<0.000000e+00> : vector<8x512xf32>
    %11 = tpu.matmul %9, %10, %cst_8 {dimension_numbers = #tpu.dot_dimension_numbers<[1], [0], [0], [1], [0, 0, 1, 1], [], []>} : vector<8x256xbf16>, vector<256x512xbf16>, vector<8x512xf32> -> vector<8x512xf32>
    %c0_9 = arith.constant 0 : index
    %c0_10 = arith.constant 0 : index
    %12 = vector.load %arg5[%c0_9, %c0_10] : memref<1x512xf32, #tpu.memory_space<vmem>>, vector<1x512xf32>
    %13 = vector.broadcast %12 : vector<1x512xf32> to vector<8x512xf32>
    %14 = arith.addf %11, %13 : vector<8x512xf32>
    %cst_11 = arith.constant 0.000000e+00 : f32
    %15 = vector.broadcast %cst_11 : f32 to vector<8x512xf32>
    %16 = arith.maximumf %14, %15 : vector<8x512xf32>
    %17 = arith.truncf %16 : vector<8x512xf32> to vector<8x512xbf16>
    %c0_12 = arith.constant 0 : index
    %c0_13 = arith.constant 0 : index
    %18 = vector.load %arg6[%c0_12, %c0_13] : memref<512x128xbf16, #tpu.memory_space<vmem>>, vector<512x128xbf16>
    %cst_14 = arith.constant dense<0.000000e+00> : vector<8x128xf32>
    %19 = tpu.matmul %17, %18, %cst_14 {dimension_numbers = #tpu.dot_dimension_numbers<[1], [0], [0], [1], [0, 0, 1, 1], [], []>} : vector<8x512xbf16>, vector<512x128xbf16>, vector<8x128xf32> -> vector<8x128xf32>
    %c0_15 = arith.constant 0 : index
    %c0_16 = arith.constant 0 : index
    %20 = vector.load %arg7[%c0_15, %c0_16] : memref<1x128xf32, #tpu.memory_space<vmem>>, vector<1x128xf32>
    %21 = vector.broadcast %20 : vector<1x128xf32> to vector<8x128xf32>
    %22 = arith.addf %19, %21 : vector<8x128xf32>
    %c0_17 = arith.constant 0 : index
    %c0_18 = arith.constant 0 : index
    %23 = vector.load %arg8[%c0_17, %c0_18] : memref<8x128xf32, #tpu.memory_space<vmem>>, vector<8x128xf32>
    tpu.vector_store %arg8[%c0_17, %c0_18], %22 {strides = array<i32>} : memref<8x128xf32, #tpu.memory_space<vmem>>, vector<8x128xf32>,
    return
  }
  func.func @transform_0(%arg0: i32) -> (i32, i32) {
    %c0_i32 = arith.constant 0 : i32
    %c0_i32_0 = arith.constant 0 : i32
    %c0_i32_1 = arith.constant 0 : i32
    return %c0_i32, %c0_i32_0 : i32, i32
  }
  func.func @transform_1(%arg0: i32) -> (i32, i32) {
    %c0_i32 = arith.constant 0 : i32
    %c0_i32_0 = arith.constant 0 : i32
    %c0_i32_1 = arith.constant 0 : i32
    return %c0_i32, %c0_i32_0 : i32, i32
  }
  func.func @transform_2(%arg0: i32) -> (i32, i32) {
    %c0_i32 = arith.constant 0 : i32
    %c0_i32_0 = arith.constant 0 : i32
    %c0_i32_1 = arith.constant 0 : i32
    return %c0_i32, %c0_i32_0 : i32, i32
  }
  func.func @transform_3(%arg0: i32) -> (i32, i32) {
    %c0_i32 = arith.constant 0 : i32
    %c0_i32_0 = arith.constant 0 : i32
    %c0_i32_1 = arith.constant 0 : i32
    return %c0_i32, %c0_i32_0 : i32, i32
  }
  func.func @transform_4(%arg0: i32) -> (i32, i32) {
    %c0_i32 = arith.constant 0 : i32
    %c0_i32_0 = arith.constant 0 : i32
    %c0_i32_1 = arith.constant 0 : i32
    return %c0_i32, %c0_i32_0 : i32, i32
  }
  func.func @transform_5(%arg0: i32) -> (i32, i32) {
    %c0_i32 = arith.constant 0 : i32
    %c0_i32_0 = arith.constant 0 : i32
    return %c0_i32, %arg0 : i32, i32
  }
  func.func @transform_6(%arg0: i32) -> (i32, i32) {
    %c0_i32 = arith.constant 0 : i32
    %c0_i32_0 = arith.constant 0 : i32
    return %c0_i32, %arg0 : i32, i32
  }
  func.func @transform_7(%arg0: i32) -> (i32, i32) {
    %c0_i32 = arith.constant 0 : i32
    %c0_i32_0 = arith.constant 0 : i32
    return %c0_i32, %arg0 : i32, i32
  }
}

</mosaic_0001>

<bundles_post_ra>
// kernel: tpu_custom_call.1
= control target key start
LH: loop header
LB: loop body
LE: loop exit
PB: predicated region body
PF: predicated region fallthrough
CT: control target
= control target key end

     0   :  { %12 = vsyncpa [#allocation3], 0  ;;  %s1570_s0 = inlined_call_operand.hbm [shape: f32[8,32], index: 0, kind: input, shape index: {}]   ;;  %s1571_s1 = inlined_call_operand.hbm [shape: bf16[32,256], index: 1, kind: input, shape index: {}]   ;;  %s1572_s2 = inlined_call_operand.vmem [shape: f32[1,256], index: 2, kind: input, shape index: {}]   ;;  %s1573_s3 = inlined_call_operand.hbm [shape: bf16[256,512], index: 3, kind: input, shape index: {}]   ;;  %s1574_s4 = inlined_call_operand.vmem [shape: f32[1,512], index: 4, kind: input, shape index: {}]   ;;  %s1575_s5 = inlined_call_operand.hbm [shape: bf16[512,128], index: 5, kind: input, shape index: {}]   ;;  %s1576_s6 = inlined_call_operand.vmem [shape: f32[1,128], index: 6, kind: input, shape index: {}]   ;;  %s1577_s7 = inlined_call_operand.hbm [shape: f32[8,128], index: 7, kind: output, shape index: {}]  }
   0x1   :  { %13 = vsyncpa [#allocation6], 0 }
   0x2   :  { %14 = vsyncpa [#allocation9], 0 }
   0x3   :  { %15 = vsyncpa [#allocation4], 0  ;;  %s1435_s24 = smov [#allocation5]   ;;  %s1317_s28 = scalar_lea.hbm %s1571_s1, 512 }
   0x4   :  { %s31_s25 = sshll.u32 %s1435_s24, 4  ;;  %p1318_p0 = scmp.ne.s32.totalorder %s1571_s1, %s1317_s28  ;;  %s32_s25 = int_to_ptr.vmem [resolvable:$true] %s31_s25 }
   0x5   :  { %p1321_p1 = scmp.lt.u32.totalorder %s1317_s28, %s1571_s1 }
   0x7   :  { %p1323_p2 = pnand %p1321_p1, %p1318_p0 }
   0x9   :  { %1326 = shalt.err (!%p1323_p2)
}
   0xa   :  { %s1327_s10 = scalar_lea.vmem %s32_s25, 512  ;;  %p1332_p4 = scmp.lt.s32.totalorder %s32_s25, %s32_s25 }
   0xb   :  { %p1328_p3 = scmp.ne.s32.totalorder %s32_s25, %s1327_s10  ;;  %p1333_p5 = scmp.lt.s32.totalorder %s1327_s10, %s1327_s10 }
   0xd   :  { %p1334_p6 = por %p1333_p5, %p1332_p4 }
   0xf   :  { %p1335_p7 = pnand %p1334_p6, %p1328_p3 }
  0x11   :  { %1338 = shalt.err (!%p1335_p7)
}
  0x12   :  { %s1436_s11 = smov 128   ;;  %s1437_s12 = smov 8  }
  0x13   :  { %37 = dma.hbm_to_vmem [thread:$0]  %s1571_s1, 512, %s32_s25, [#allocation6], %s1436_s11, %s1436_s11, %s1437_s12  }
  0x14   :  { %s1438_s15 = smov [#allocation2]   ;;  %s1439_s17 = smov [#allocation7]  }
  0x15   :  { %s22_s16 = sshll.u32 %s1438_s15, 4  ;;  %s45_s18 = sshll.u32 %s1439_s17, 4  ;;  %s23_s16 = int_to_ptr.vmem [resolvable:$true] %s22_s16  ;;  %s46_s18 = int_to_ptr.vmem [resolvable:$true] %s45_s18 }
  0x16   :  { %s1339_s21 = scalar_lea.hbm %s1570_s0, 128 }
  0x17   :  { %p1340_p8 = scmp.ne.s32.totalorder %s1570_s0, %s1339_s21  ;;  %p1343_p9 = scmp.lt.u32.totalorder %s1339_s21, %s1570_s0 }
  0x19   :  { %p1345_p10 = pnand %p1343_p9, %p1340_p8 }
  0x1b   :  { %1348 = shalt.err (!%p1345_p10)
}
  0x1c   :  { %s1349_s1 = scalar_lea.vmem %s23_s16, 128  ;;  %p1354_p12 = scmp.lt.s32.totalorder %s23_s16, %s23_s16 }
  0x1d   :  { %p1350_p11 = scmp.ne.s32.totalorder %s23_s16, %s1349_s1  ;;  %p1355_p13 = scmp.lt.s32.totalorder %s1349_s1, %s1349_s1 }
  0x1f   :  { %p1356_p0 = por %p1355_p13, %p1354_p12 }
  0x21   :  { %p1357_p1 = pnand %p1356_p0, %p1350_p11 }
  0x23   :  { %1360 = shalt.err (!%p1357_p1)
}
  0x24   :  { %25 = dma.hbm_to_vmem [thread:$0]  %s1570_s0, 128, %s23_s16, [#allocation3]  }
  0x25   :  { %s1361_s30 = scalar_lea.hbm %s1573_s3, 8192 }
  0x26   :  { %p1362_p2 = scmp.ne.s32.totalorder %s1573_s3, %s1361_s30  ;;  %p1365_p3 = scmp.lt.u32.totalorder %s1361_s30, %s1573_s3 }
  0x28   :  { %p1367_p4 = pnand %p1365_p3, %p1362_p2 }
  0x2a   :  { %1370 = shalt.err (!%p1367_p4)
}
  0x2b   :  { %s1371_s12 = scalar_lea.vmem %s46_s18, 8192  ;;  %p1376_p6 = scmp.lt.s32.totalorder %s46_s18, %s46_s18 }
  0x2c   :  { %p1372_p5 = scmp.ne.s32.totalorder %s46_s18, %s1371_s12  ;;  %p1377_p7 = scmp.lt.s32.totalorder %s1371_s12, %s1371_s12 }
  0x2e   :  { %p1378_p8 = por %p1377_p7, %p1376_p6 }
  0x30   :  { %p1379_p9 = pnand %p1378_p8, %p1372_p5 }
  0x32   :  { %1382 = shalt.err (!%p1379_p9)
}
  0x33   :  { %s1440_s0 = smov 256   ;;  %s1441_s13 = smov 16  }
  0x34   :  { %51 = dma.hbm_to_vmem [thread:$0]  %s1573_s3, 8192, %s46_s18, [#allocation6], %s1440_s0, %s1440_s0, %s1441_s13  }
  0x35   :  { %s1442_s16 = smov [#allocation8]   ;;  %s1383_s21 = scalar_lea.hbm %s1575_s5, 4096 }
  0x36   :  { %s59_s17 = sshll.u32 %s1442_s16, 4  ;;  %p1384_p10 = scmp.ne.s32.totalorder %s1575_s5, %s1383_s21  ;;  %s60_s17 = int_to_ptr.vmem [resolvable:$true] %s59_s17 }
  0x37   :  { %p1387_p11 = scmp.lt.u32.totalorder %s1383_s21, %s1575_s5 }
  0x39   :  { %p1389_p12 = pnand %p1387_p11, %p1384_p10 }
  0x3b   :  { %1392 = shalt.err (!%p1389_p12)
}
  0x3c   :  { %s1393_s1 = scalar_lea.vmem %s60_s17, 4096  ;;  %p1398_p0 = scmp.lt.s32.totalorder %s60_s17, %s60_s17 }
  0x3d   :  { %p1394_p13 = scmp.ne.s32.totalorder %s60_s17, %s1393_s1  ;;  %p1399_p1 = scmp.lt.s32.totalorder %s1393_s1, %s1393_s1 }
  0x3f   :  { %p1400_p2 = por %p1399_p1, %p1398_p0 }
  0x41   :  { %p1401_p3 = pnand %p1400_p2, %p1394_p13 }
  0x43   :  { %1404 = shalt.err (!%p1401_p3)
}
  0x44   :  { %s1443_s3 = smov 64   ;;  %s1444_s18 = smov 4  }
  0x45   :  { %65 = dma.hbm_to_vmem [thread:$0]  %s1575_s5, 4096, %s60_s17, [#allocation9], %s1443_s3, %s1443_s3, %s1444_s18  }
  0x46   :  { %1427 = dma.done.wait [#allocation3], 128  }
  0x47   :  { %1428 = vsyncadd [#allocation3], 4294967168 }
  0x48   :  { %1429 = dma.done.wait [#allocation6], 8704  }
  0x49   :  { %1430 = vsyncadd [#allocation6], 4294958592 }
  0x4a   :  { %1431 = dma.done.wait [#allocation9], 4096  }
  0x4b   :  { %1432 = vsyncadd [#allocation9], 4294963200  ;;  %v1445_v0 = vmov 0   ;;  %v1183_v1 = vld [vmem:[#allocation5 + $0x4] ss:$8 sps:$4 sm:$0xff]   ;;  %v81_v5 = vld [vmem:[#allocation2] sm:$0xff] }
  0x4c   :  { %155 = vmatprep.mubr.bf16.mxu0 %v1445_v0  ;;  %v1185_v2 = vld [vmem:[#allocation5] ss:$8 sps:$4 sm:$0xff]   ;;  %123 = vmatprep.subr.bf16.mxu0 %v1183_v1  ;;  %v1186_v3 = vld [vmem:[#allocation5 + $0x14] ss:$8 sps:$4 sm:$0xff]   ;;  %v1188_v4 = vld [vmem:[#allocation5 + $0x10] ss:$8 sps:$4 sm:$0xff]   ;;  %v82_v9 = vpack.c.bf16 %v81_v5, %v81_v5 }
  0x4d   :  { %124 = vmatpush1.bf16.msra.mxu0 %v1185_v2  ;;  %v1189_v6 = vld [vmem:[#allocation7 + $0x4] ss:$16 sps:$4 sm:$0xff]   ;;  %v1193_v7 = vld [vmem:[#allocation7 + $0xc] ss:$16 sps:$4 sm:$0xff]   ;;  %v1194_v8 = vld [vmem:[#allocation7] ss:$16 sps:$4 sm:$0xff]  }
  0x4e   :  { %125 = vmatprep.subr.bf16.mxu0 %v1186_v3  ;;  %574 = vmatprep.subr.bf16.mxu1 %v1189_v6  ;;  %v1195_v10 = vld [vmem:[#allocation7 + $0x24] ss:$16 sps:$4 sm:$0xff]   ;;  %vm119_vm0 = vcmask 261120   ;;  %v1191_v11 = vld [vmem:[#allocation7 + $0x8] ss:$16 sps:$4 sm:$0xff]   ;;  %s1446_s8 = smov [#allocation10]  }
  0x4f   :  { %575 = vmatpush1.bf16.msra.mxu1 %v1194_v8  ;;  %v1199_v12 = vld [vmem:[#allocation7 + $0x2c] ss:$16 sps:$4 sm:$0xff]   ;;  %v1200_v13 = vld [vmem:[#allocation7 + $0x20] ss:$16 sps:$4 sm:$0xff]   ;;  %v1201_v14 = vld [vmem:[#allocation7 + $0x44] ss:$16 sps:$4 sm:$0xff]  }
  0x50   :  { %576 = vmatprep.subr.bf16.mxu1 %v1195_v10  ;;  %v1197_v15 = vld [vmem:[#allocation7 + $0x28] ss:$16 sps:$4 sm:$0xff]   ;;  %v1205_v16 = vld [vmem:[#allocation7 + $0x4c] ss:$16 sps:$4 sm:$0xff]   ;;  %v1206_v17 = vld [vmem:[#allocation7 + $0x40] ss:$16 sps:$4 sm:$0xff]  }
  0x51   :  { %126 = vmatpush1.bf16.msra.mxu0 %v1188_v4  ;;  %v1207_v18 = vld [vmem:[#allocation7 + $0x64] ss:$16 sps:$4 sm:$0xff]   ;;  %v1203_v19 = vld [vmem:[#allocation7 + $0x48] ss:$16 sps:$4 sm:$0xff]   ;;  %v1211_v20 = vld [vmem:[#allocation7 + $0x6c] ss:$16 sps:$4 sm:$0xff]  }
  0x52   :  { %615 = vmatprep.subr.bf16.mxu0 %v1193_v7  ;;  %v1212_v21 = vld [vmem:[#allocation7 + $0x60] ss:$16 sps:$4 sm:$0xff]   ;;  %v1213_v22 = vld [vmem:[#allocation7 + $0x84] ss:$16 sps:$4 sm:$0xff]   ;;  %v1209_v23 = vld [vmem:[#allocation7 + $0x68] ss:$16 sps:$4 sm:$0xff]  }
  0x53   :  { %577 = vmatpush1.bf16.msra.mxu1 %v1200_v13  ;;  %v1217_v24 = vld [vmem:[#allocation7 + $0x8c] ss:$16 sps:$4 sm:$0xff]   ;;  %v1218_v25 = vld [vmem:[#allocation7 + $0x80] ss:$16 sps:$4 sm:$0xff]   ;;  %v1219_v26 = vld [vmem:[#allocation7 + $0xa4] ss:$16 sps:$4 sm:$0xff]  }
  0x54   :  { %1029 = vmatmul.mubr.msk.bf16.vlgmr.msra.gmra.mrb[0].mxu0 %vm119_vm0, %v82_v9  ;;  %578 = vmatprep.subr.bf16.mxu1 %v1201_v14  ;;  %v1215_v27 = vld [vmem:[#allocation7 + $0x88] ss:$16 sps:$4 sm:$0xff]   ;;  %v1223_v28 = vld [vmem:[#allocation7 + $0xac] ss:$16 sps:$4 sm:$0xff]   ;;  %v1224_v29 = vld [vmem:[#allocation7 + $0xa0] ss:$16 sps:$4 sm:$0xff]   ;;  %v89_v9 = vlaneseq }
  0x55   :  { %616 = vmatpush1.bf16.msra.mxu0 %v1191_v11  ;;  %v1225_v30 = vld [vmem:[#allocation7 + $0xc4] ss:$16 sps:$4 sm:$0xff]   ;;  %v1221_v31 = vld [vmem:[#allocation7 + $0xa8] ss:$16 sps:$4 sm:$0xff]   ;;  %v1229_v32 = vld [vmem:[#allocation7 + $0xcc] ss:$16 sps:$4 sm:$0xff]  }
  0x56   :  { %617 = vmatprep.subr.bf16.mxu0 %v1199_v12  ;;  %v1230_v33 = vld [vmem:[#allocation7 + $0xc0] ss:$16 sps:$4 sm:$0xff]   ;;  %v1231_v34 = vld [vmem:[#allocation7 + $0xe4] ss:$16 sps:$4 sm:$0xff]   ;;  %v1227_v35 = vld [vmem:[#allocation7 + $0xc8] ss:$16 sps:$4 sm:$0xff]  }
  0x57   :  { %579 = vmatpush1.bf16.msra.mxu1 %v1206_v17  ;;  %v1235_v36 = vld [vmem:[#allocation7 + $0xec] ss:$16 sps:$4 sm:$0xff]   ;;  %v1236_v37 = vld [vmem:[#allocation7 + $0xe0] ss:$16 sps:$4 sm:$0xff]   ;;  %v1237_v38 = vld [vmem:[#allocation7 + $0x104] ss:$16 sps:$4 sm:$0xff]  }
  0x58   :  { %580 = vmatprep.subr.bf16.mxu1 %v1207_v18  ;;  %v1233_v39 = vld [vmem:[#allocation7 + $0xe8] ss:$16 sps:$4 sm:$0xff]   ;;  %v1241_v40 = vld [vmem:[#allocation7 + $0x10c] ss:$16 sps:$4 sm:$0xff]   ;;  %v1242_v41 = vld [vmem:[#allocation7 + $0x100] ss:$16 sps:$4 sm:$0xff]  }
  0x59   :  { %618 = vmatpush1.bf16.msra.mxu0 %v1197_v15  ;;  %v1243_v42 = vld [vmem:[#allocation7 + $0x124] ss:$16 sps:$4 sm:$0xff]   ;;  %v1239_v43 = vld [vmem:[#allocation7 + $0x108] ss:$16 sps:$4 sm:$0xff]   ;;  %v1248_v44 = vld [vmem:[#allocation7 + $0x120] ss:$16 sps:$4 sm:$0xff]  }
  0x5a   :  { %619 = vmatprep.subr.bf16.mxu0 %v1205_v16  ;;  %v1247_v45 = vld [vmem:[#allocation7 + $0x12c] ss:$16 sps:$4 sm:$0xff]   ;;  %v1249_v46 = vld [vmem:[#allocation7 + $0x144] ss:$16 sps:$4 sm:$0xff]   ;;  %v1245_v47 = vld [vmem:[#allocation7 + $0x128] ss:$16 sps:$4 sm:$0xff]  }
  0x5b   :  { %581 = vmatpush1.bf16.msra.mxu1 %v1212_v21  ;;  %v1254_v48 = vld [vmem:[#allocation7 + $0x140] ss:$16 sps:$4 sm:$0xff]   ;;  %v1253_v49 = vld [vmem:[#allocation7 + $0x14c] ss:$16 sps:$4 sm:$0xff]   ;;  %v1255_v50 = vld [vmem:[#allocation7 + $0x164] ss:$16 sps:$4 sm:$0xff]  }
  0x5c   :  { %582 = vmatprep.subr.bf16.mxu1 %v1213_v22  ;;  %v1251_v51 = vld [vmem:[#allocation7 + $0x148] ss:$16 sps:$4 sm:$0xff]   ;;  %v1260_v52 = vld [vmem:[#allocation7 + $0x160] ss:$16 sps:$4 sm:$0xff]   ;;  %v1259_v53 = vld [vmem:[#allocation7 + $0x16c] ss:$16 sps:$4 sm:$0xff]  }
  0x5d   :  { %620 = vmatpush1.bf16.msra.mxu0 %v1203_v19  ;;  %v1261_v54 = vld [vmem:[#allocation7 + $0x184] ss:$16 sps:$4 sm:$0xff]   ;;  %v1257_v55 = vld [vmem:[#allocation7 + $0x168] ss:$16 sps:$4 sm:$0xff]   ;;  %v1266_v56 = vld [vmem:[#allocation7 + $0x180] ss:$16 sps:$4 sm:$0xff]  }
  0x5e   :  { %621 = vmatprep.subr.bf16.mxu0 %v1211_v20  ;;  %v1265_v57 = vld [vmem:[#allocation7 + $0x18c] ss:$16 sps:$4 sm:$0xff]   ;;  %v1267_v58 = vld [vmem:[#allocation7 + $0x1a4] ss:$16 sps:$4 sm:$0xff]   ;;  %v1263_v59 = vld [vmem:[#allocation7 + $0x188] ss:$16 sps:$4 sm:$0xff]  }
  0x5f   :  { %583 = vmatpush1.bf16.msra.mxu1 %v1218_v25  ;;  %v1272_v60 = vld [vmem:[#allocation7 + $0x1a0] ss:$16 sps:$4 sm:$0xff]   ;;  %v1271_v61 = vld [vmem:[#allocation7 + $0x1ac] ss:$16 sps:$4 sm:$0xff]   ;;  %v1269_v62 = vld [vmem:[#allocation7 + $0x1a8] ss:$16 sps:$4 sm:$0xff]  }
  0x60   :  { %584 = vmatprep.subr.bf16.mxu1 %v1219_v26  ;;  %v1273_v63 = vld [vmem:[#allocation7 + $0x1c4] ss:$16 sps:$4 sm:$0xff]   ;;  %v1277_v0 = vld [vmem:[#allocation7 + $0x1cc] ss:$16 sps:$4 sm:$0xff]   ;;  %v1275_v1 = vld [vmem:[#allocation7 + $0x1c8] ss:$16 sps:$4 sm:$0xff]  }
  0x61   :  { %622 = vmatpush1.bf16.msra.mxu0 %v1209_v23  ;;  %v1278_v2 = vld [vmem:[#allocation7 + $0x1c0] ss:$16 sps:$4 sm:$0xff]   ;;  %v1279_v3 = vld [vmem:[#allocation7 + $0x1e4] ss:$16 sps:$4 sm:$0xff]   ;;  %v1283_v4 = vld [vmem:[#allocation7 + $0x1ec] ss:$16 sps:$4 sm:$0xff]  }
  0x62   :  { %623 = vmatprep.subr.bf16.mxu0 %v1217_v24  ;;  %v1281_v5 = vld [vmem:[#allocation7 + $0x1e8] ss:$16 sps:$4 sm:$0xff]   ;;  %v1284_v6 = vld [vmem:[#allocation7 + $0x1e0] ss:$16 sps:$4 sm:$0xff]   ;;  %v1535_v10 = vshrl.u32 %v89_v9, 7  ;;  %s1014_s9 = sshll.u32 %s1446_s8, 4  ;;  %s1015_s9 = int_to_ptr.vmem [resolvable:$true] %s1014_s9 }
  0x63   :  { %585 = vmatpush1.bf16.msra.mxu1 %v1224_v29  ;;  %v1285_v7 = vld [vmem:[#allocation8 + $0x40] sm:$0xff]   ;;  %v87_v12 = vld [vmem:[%s1572_s2] sm:$0x3]  ;;  %v1290_v29 = vld [vmem:[#allocation8 + $0xc8] sm:$0xff]   ;;  %s1405_s10 = scalar_lea.vmem %s1015_s9, 128  ;;  %p1410_p5 = scmp.lt.s32.totalorder %s1015_s9, %s1015_s9 }
  0x64   :  { %586 = vmatprep.subr.bf16.mxu1 %v1225_v30  ;;  %v1286_v8 = vld [vmem:[#allocation8 + $0xc0] sm:$0xff]   ;;  %v91_v11 = vsub.s32 0, %v1535_v10  ;;  %v95_v13 = vsub.s32 1, %v1535_v10  ;;  %v1291_v30 = vld [vmem:[#allocation8 + $0x8] sm:$0xff]   ;;  %p1406_p4 = scmp.ne.s32.totalorder %s1015_s9, %s1405_s10  ;;  %p1411_p6 = scmp.lt.s32.totalorder %s1405_s10, %s1405_s10 }
  0x65   :  { %624 = vmatpush1.bf16.msra.mxu0 %v1215_v27  ;;  %v1287_v25 = vld [vmem:[#allocation8] sm:$0xff]  }
  0x66   :  { %625 = vmatprep.subr.bf16.mxu0 %v1223_v28  ;;  %v92_v14 = vrot.slane %v87_v12, %v91_v11  ;;  %v96_v15 = vrot.slane %v87_v12, %v95_v13  ;;  %v1288_v26 = vld [vmem:[#allocation8 + $0x80] sm:$0xff]   ;;  %v1289_v28 = vld [vmem:[#allocation8 + $0x48] sm:$0xff]   ;;  %p1412_p7 = por %p1411_p6, %p1410_p5 }
  0x67   :  { %587 = vmatpush1.bf16.msra.mxu1 %v1230_v33  ;;  %v1294_v33 = vld [vmem:[#allocation8 + $0xd0] sm:$0xff]  }
  0x68   :  { %588 = vmatprep.subr.bf16.mxu1 %v1231_v34  ;;  %v1295_v34 = vld [vmem:[#allocation8 + $0x10] sm:$0xff]   ;;  %p1413_p8 = pnand %p1412_p7, %p1406_p4 }
  0x69   :  { %626 = vmatpush1.bf16.msra.mxu0 %v1221_v31  ;;  %v1292_v31 = vld [vmem:[#allocation8 + $0x88] sm:$0xff]  }
  0x6a   :  { %627 = vmatprep.subr.bf16.mxu0 %v1229_v32  ;;  %v1293_v32 = vld [vmem:[#allocation8 + $0x50] sm:$0xff]  }
  0x6b   :  { %589 = vmatpush1.bf16.msra.mxu1 %v1236_v37  ;;  %v1298_v37 = vld [vmem:[#allocation8 + $0xd8] sm:$0xff]  }
  0x6c   :  { %590 = vmatprep.subr.bf16.mxu1 %v1237_v38  ;;  %v1299_v38 = vld [vmem:[#allocation8 + $0x18] sm:$0xff]  }
  0x6d   :  { %628 = vmatpush1.bf16.msra.mxu0 %v1227_v35  ;;  %v1296_v35 = vld [vmem:[#allocation8 + $0x90] sm:$0xff]  }
  0x6e   :  { %629 = vmatprep.subr.bf16.mxu0 %v1235_v36  ;;  %v1297_v36 = vld [vmem:[#allocation8 + $0x58] sm:$0xff]  }
  0x6f   :  { %591 = vmatpush1.bf16.msra.mxu1 %v1242_v41  ;;  %v1302_v41 = vld [vmem:[#allocation8 + $0xe0] sm:$0xff]  }
  0x70   :  { %592 = vmatprep.subr.bf16.mxu1 %v1243_v42  ;;  %v1303_v42 = vld [vmem:[#allocation8 + $0x20] sm:$0xff]  }
  0x71   :  { %630 = vmatpush1.bf16.msra.mxu0 %v1233_v39  ;;  %v1300_v39 = vld [vmem:[#allocation8 + $0x98] sm:$0xff]  }
  0x72   :  { %631 = vmatprep.subr.bf16.mxu0 %v1241_v40  ;;  %v1301_v40 = vld [vmem:[#allocation8 + $0x60] sm:$0xff]  }
  0x73   :  { %593 = vmatpush1.bf16.msra.mxu1 %v1248_v44  ;;  %v1305_v44 = vld [vmem:[#allocation8 + $0x68] sm:$0xff]  }
  0x74   :  { %594 = vmatprep.subr.bf16.mxu1 %v1249_v46  ;;  %v1307_v46 = vld [vmem:[#allocation8 + $0x28] sm:$0xff]  }
  0x75   :  { %632 = vmatpush1.bf16.msra.mxu0 %v1239_v43  ;;  %v1304_v43 = vld [vmem:[#allocation8 + $0xa0] sm:$0xff]  }
  0x76   :  { %633 = vmatprep.subr.bf16.mxu0 %v1247_v45  ;;  %v1306_v45 = vld [vmem:[#allocation8 + $0xe8] sm:$0xff]  }
  0x77   :  { %595 = vmatpush1.bf16.msra.mxu1 %v1254_v48  ;;  %v1309_v48 = vld [vmem:[#allocation8 + $0x70] sm:$0xff]  }
  0x78   :  { %596 = vmatprep.subr.bf16.mxu1 %v1255_v50  ;;  %v1311_v50 = vld [vmem:[#allocation8 + $0x30] sm:$0xff]  }
  0x79   :  { %634 = vmatpush1.bf16.msra.mxu0 %v1245_v47  ;;  %v1308_v47 = vld [vmem:[#allocation8 + $0xa8] sm:$0xff]  }
  0x7a   :  { %635 = vmatprep.subr.bf16.mxu0 %v1253_v49  ;;  %v1310_v49 = vld [vmem:[#allocation8 + $0xf0] sm:$0xff]  }
  0x7b   :  { %597 = vmatpush1.bf16.msra.mxu1 %v1260_v52  ;;  %v1313_v52 = vld [vmem:[#allocation8 + $0x78] sm:$0xff]  }
  0x7c   :  { %598 = vmatprep.subr.bf16.mxu1 %v1261_v54  ;;  %v1315_v54 = vld [vmem:[#allocation8 + $0x38] sm:$0xff]  }
  0x7d   :  { %636 = vmatpush1.bf16.msra.mxu0 %v1251_v51  ;;  %v1312_v51 = vld [vmem:[#allocation8 + $0xb0] sm:$0xff]  }
  0x7e   :  { %637 = vmatprep.subr.bf16.mxu0 %v1259_v53  ;;  %v1314_v53 = vld [vmem:[#allocation8 + $0xf8] sm:$0xff]  }
  0x7f   :  { %599 = vmatpush1.bf16.msra.mxu1 %v1266_v56  ;;  %v244_v56 = vsub.s32 2, %v1535_v10 }
  0x80   :  { %600 = vmatprep.subr.bf16.mxu1 %v1267_v58  ;;  %v248_v58 = vsub.s32 3, %v1535_v10 }
  0x81   :  { %638 = vmatpush1.bf16.msra.mxu0 %v1257_v55  ;;  %v1316_v55 = vld [vmem:[#allocation8 + $0xb8] sm:$0xff]  }
  0x82   :  { %639 = vmatprep.subr.bf16.mxu0 %v1265_v57  ;;  %v232_v57 = vld [vmem:[%s1574_s4] sm:$0xf] }
  0x83   :  { %601 = vmatpush1.bf16.msra.mxu1 %v1272_v60  ;;  %v245_v60 = vrot.slane %v232_v57, %v244_v56 }
  0x84   :  { %602 = vmatprep.subr.bf16.mxu1 %v1273_v63 }
  0x85   :  { %640 = vmatpush1.bf16.msra.mxu0 %v1263_v59  ;;  %v237_v59 = vrot.slane %v232_v57, %v91_v11 }
  0x86   :  { %641 = vmatprep.subr.bf16.mxu0 %v1271_v61  ;;  %v241_v61 = vrot.slane %v232_v57, %v95_v13 }
  0x87   :  { %603 = vmatpush1.bf16.msra.mxu1 %v1278_v2 }
  0x88   :  { %604 = vmatprep.subr.bf16.mxu1 %v1279_v3 }
  0x89   :  { %642 = vmatpush1.bf16.msra.mxu0 %v1269_v62  ;;  %v249_v62 = vrot.slane %v232_v57, %v248_v58 }
  0x8a   :  { %643 = vmatprep.subr.bf16.mxu0 %v1277_v0 }
  0x8b   :  { %605 = vmatpush1.bf16.msra.mxu1 %v1284_v6 }
  0x8c   :  { %1127 = vmatprep.subr.bf16.mxu1 %v1285_v7 }
  0x8d   :  { %644 = vmatpush1.bf16.msra.mxu0 %v1275_v1 }
  0x8e   :  { %645 = vmatprep.subr.bf16.mxu0 %v1283_v4 }
  0x91   :  { %646 = vmatpush1.bf16.msra.mxu0 %v1281_v5 }
  0x92   :  { %1149 = vmatprep.subr.bf16.mxu0 %v1286_v8 }
 0x127   :  { %v157_v16 = vpop.f32.mrb[0].mxu0 }
 0x128   :  { %v158_v17 = vadd.f32 %v157_v16, %v92_v14  ;;  %v159_v18 = vpop.f32.mrb[1].mxu0 }
 0x129   :  { %v160_v19 = vadd.f32 %v159_v18, %v96_v15  ;;  %v161_v20 = vpop.f32.mrb[2].mxu0 }
 0x12a   :  { %v164_v21 = vmax.f32 %v158_v17, 0.0  ;;  %v162_v22 = vpop.f32.mrb[3].mxu0 }
 0x12b   :  { %v165_v23 = vmax.f32 %v160_v19, 0.0 }
 0x12c   :  { %v166_v27 = vpack.c.bf16 %v164_v21, %v164_v21  ;;  %v1094_v21 = vld [vmem:[%s1576_s6] ss:$0 sm:$0xff] }
 0x12d   :  { %v167_v24 = vpack.c.bf16 %v165_v23, %v165_v23 }
 0x12f   :  { %606 = vmatprep.mubr.bf16.mxu1 %v167_v24  ;;  %647 = vmatprep.mubr.bf16.mxu0 %v167_v24 }
 0x130   :  { %607 = vmatmul.mubr.bf16.vlgmr.msra.gmra.mrb[0].mxu1 %v166_v27  ;;  %648 = vmatmul.mubr.bf16.vlgmr.msra.gmra.mrb[4].mxu0 %v166_v27 }
 0x131   :  { %1128 = vmatpush3.bf16.msra.mxu1 %v1287_v25  ;;  %1150 = vmatpush3.bf16.msra.mxu0 %v1288_v26 }
 0x132   :  { %1129 = vmatprep.subr.bf16.mxu1 %v1289_v28  ;;  %1151 = vmatprep.subr.bf16.mxu0 %v1290_v29 }
 0x135   :  { %1130 = vmatpush3.bf16.msra.mxu1 %v1291_v30  ;;  %1152 = vmatpush3.bf16.msra.mxu0 %v1292_v31 }
 0x136   :  { %1131 = vmatprep.subr.bf16.mxu1 %v1293_v32  ;;  %1153 = vmatprep.subr.bf16.mxu0 %v1294_v33 }
 0x139   :  { %1132 = vmatpush3.bf16.msra.mxu1 %v1295_v34  ;;  %1154 = vmatpush3.bf16.msra.mxu0 %v1296_v35 }
 0x13a   :  { %1133 = vmatprep.subr.bf16.mxu1 %v1297_v36  ;;  %1155 = vmatprep.subr.bf16.mxu0 %v1298_v37 }
 0x13d   :  { %1134 = vmatpush3.bf16.msra.mxu1 %v1299_v38  ;;  %1156 = vmatpush3.bf16.msra.mxu0 %v1300_v39 }
 0x13e   :  { %1135 = vmatprep.subr.bf16.mxu1 %v1301_v40  ;;  %1157 = vmatprep.subr.bf16.mxu0 %v1302_v41 }
 0x141   :  { %1136 = vmatpush3.bf16.msra.mxu1 %v1303_v42  ;;  %1158 = vmatpush3.bf16.msra.mxu0 %v1304_v43 }
 0x142   :  { %1137 = vmatprep.subr.bf16.mxu1 %v1305_v44  ;;  %1159 = vmatprep.subr.bf16.mxu0 %v1306_v45 }
 0x145   :  { %1138 = vmatpush3.bf16.msra.mxu1 %v1307_v46  ;;  %1160 = vmatpush3.bf16.msra.mxu0 %v1308_v47 }
 0x146   :  { %1139 = vmatprep.subr.bf16.mxu1 %v1309_v48  ;;  %1161 = vmatprep.subr.bf16.mxu0 %v1310_v49 }
 0x149   :  { %1140 = vmatpush3.bf16.msra.mxu1 %v1311_v50  ;;  %1162 = vmatpush3.bf16.msra.mxu0 %v1312_v51 }
 0x14a   :  { %1141 = vmatprep.subr.bf16.mxu1 %v1313_v52  ;;  %1163 = vmatprep.subr.bf16.mxu0 %v1314_v53 }
 0x14d   :  { %1142 = vmatpush3.bf16.msra.mxu1 %v1315_v54  ;;  %1164 = vmatpush3.bf16.msra.mxu0 %v1316_v55 }
 0x203   :  { %v608_v63 = vpop.f32.mrb[0].mxu1  ;;  %v649_v0 = vpop.f32.mrb[4].mxu0 }
 0x204   :  { %v609_v1 = vadd.f32 %v608_v63, %v237_v59  ;;  %v650_v2 = vadd.f32 %v649_v0, %v245_v60  ;;  %v610_v3 = vpop.f32.mrb[1].mxu1  ;;  %v651_v4 = vpop.f32.mrb[5].mxu0 }
 0x205   :  { %v611_v5 = vadd.f32 %v610_v3, %v241_v61  ;;  %v652_v6 = vadd.f32 %v651_v4, %v249_v62  ;;  %v612_v7 = vpop.f32.mrb[2].mxu1  ;;  %v653_v8 = vpop.f32.mrb[6].mxu0 }
 0x206   :  { %v656_v9 = vmax.f32 %v609_v1, 0.0  ;;  %v658_v12 = vmax.f32 %v650_v2, 0.0  ;;  %v613_v14 = vpop.f32.mrb[3].mxu1  ;;  %v654_v15 = vpop.f32.mrb[7].mxu0 }
 0x207   :  { %v657_v11 = vmax.f32 %v611_v5, 0.0  ;;  %v659_v16 = vmax.f32 %v652_v6, 0.0 }
 0x208   :  { %v660_v13 = vpack.c.bf16 %v656_v9, %v656_v9  ;;  %v662_v18 = vpack.c.bf16 %v658_v12, %v658_v12 }
 0x209   :  { %v661_v17 = vpack.c.bf16 %v657_v11, %v657_v11  ;;  %v663_v10 = vpack.c.bf16 %v659_v16, %v659_v16 }
 0x20b   :  { %959 = vmatprep.mubr.bf16.mxu1 %v661_v17  ;;  %999 = vmatprep.mubr.bf16.mxu0 %v663_v10 }
 0x20c   :  { %960 = vmatmul.mubr.bf16.vlgmr.msra.gmra.mrb[4].mxu1 %v660_v13  ;;  %1000 = vmatmul.mubr.bf16.vlgmr.msra.gmra.mrb[8].mxu0 %v662_v18 }
 0x2df   :  { %v1143_v19 = vpop.f32.mrb[4].mxu1  ;;  %v1165_v20 = vpop.f32.mrb[8].mxu0 }
 0x2e0   :  { %v1144_v22 = vpop.f32.mrb[5].mxu1  ;;  %v1166_v23 = vpop.f32.mrb[9].mxu0 }
 0x2e1   :  { %v1145_v24 = vadd.f32 %v1144_v22, %v1143_v19  ;;  %v1167_v25 = vadd.f32 %v1166_v23, %v1165_v20  ;;  %v1146_v26 = vpop.f32.mrb[6].mxu1  ;;  %v1168_v27 = vpop.f32.mrb[10].mxu0 }
 0x2e2   :  { %v1147_v28 = vpop.f32.mrb[7].mxu1  ;;  %v1169_v29 = vpop.f32.mrb[11].mxu0 }
 0x2e3   :  { %v962_v30 = vadd.f32 %v1145_v24, %v1094_v21 }
 0x2e5   :  { %v1002_v31 = vadd.f32 %v1167_v25, %v962_v30 }
 0x2e7   :  { %1007 = vst [vmem:[#allocation10] sm:$0xff] %v1002_v31 }
 0x2e8   :  { %1416 = shalt.err (!%p1413_p8)
}
 0x2e9   :  { %s1417_s12 = scalar_lea.hbm %s1577_s7, 128 }
 0x2ea   :  { %p1418_p9 = scmp.ne.s32.totalorder %s1577_s7, %s1417_s12  ;;  %p1421_p10 = scmp.lt.u32.totalorder %s1417_s12, %s1577_s7 }
 0x2ec   :  { %p1423_p11 = pnand %p1421_p10, %p1418_p9 }
 0x2ee   :  { %1426 = shalt.err (!%p1423_p11)
}
 0x2ef   :  { %1017 = dma.vmem_to_hbm [thread:$0]  %s1015_s9, 128, %s1577_s7, [#allocation4]  }
 0x2f0   :  { %1433 = dma.done.wait [#allocation4], 128  }
 0x2f1   :  { %1434 = vsyncadd [#allocation4], 4294967168 }
 0x2f2   :  { %1021 = vsyncpa [#allocation3], 1 }
 0x2f3   :  { %1022 = vsyncpa [#allocation6], 1 }
 0x2f4   :  { %1023 = vsyncpa [#allocation9], 1 }
 0x2f5   :  { %1024 = vsyncpa [#allocation4], 1 }

</bundles_post_ra>
